<compile_context>
chip_gen: v5e
topology: v5e:2x2
jax: 0.10.0
libtpu: 0.0.40
codegen_flags: <defaults>
</compile_context>

<pallas_src>
import functools

import jax
import jax.numpy as jnp
from jax.experimental import pallas as pl
from jax.experimental.pallas import tpu as pltpu

LANE = 128


def _round_up(v, m):
    return (v + m - 1) // m * m


def _pad_to(a, shape):
    pads = [(0, s - d) for d, s in zip(a.shape, shape)]
    if all(p == (0, 0) for p in pads):
        return a
    return jnp.pad(a, pads)


def _se_kernel(x_ref, w1_ref, b1_ref, w2_ref, b2_ref, o_ref,
               acc_ref, gate_ref, *rest, cache_x, inv_hw):
    # x_ref/o_ref: (1, C_pad, hw_tile)   w1_ref/w2_ref: (C_pad, Cr_pad)
    # b1_ref: (1, Cr_pad)  b2_ref: (C_pad, 1)
    # acc_ref:  (C_pad, 1) f32 scratch      (pooled-sum accumulator)
    # gate_ref: (C_pad, 1) out-dtype scratch (cached sigmoid gate)
    # rest[0] (optional): (n_hw, C_pad, hw_tile) VMEM sample cache
    xcache_ref = rest[0] if cache_x else None
    phase = pl.program_id(1)
    t = pl.program_id(2)
    last_t = pl.num_programs(2) - 1

    @pl.when(phase == 0)
    def _pool_phase():
        @pl.when(t == 0)
        def _init():
            acc_ref[...] = jnp.zeros_like(acc_ref)

        x = x_ref[0]                                           # (C_pad, hw_T)
        if cache_x:
            xcache_ref[t] = x                                  # VMEM copy (>> HBM BW)
        # lane reduce lowers to VPU vreg-adds + one cross-lane XLU reduce;
        # hides under the HBM DMA of the tile.
        acc_ref[...] += jnp.sum(x.astype(jnp.float32), axis=-1, keepdims=True)

        @pl.when(t == last_t)
        def _gate():
            # AdaptiveAvgPool2d(1): divide by the TRUE H*W (padded lanes /
            # padded channel rows are zero and contribute nothing).
            pooled = acc_ref[...] * inv_hw                     # (C_pad, 1) f32
            # conv1x1 (no bias) + folded BN1 + ReLU: matvec as broadcast
            # multiply + sublane reduce -> row vector.
            h = jnp.sum(w1_ref[...] * pooled, axis=0, keepdims=True)
            h = jnp.maximum(h + b1_ref[...], 0.0)              # (1, Cr_pad)
            # conv1x1 (no bias) + folded BN2 + Sigmoid: broadcast multiply +
            # lane reduce -> column vector.
            z = jnp.sum(w2_ref[...] * h, axis=1, keepdims=True)
            # Store the gate already cast to the output dtype so phase 1 is a
            # pure native-dtype VPU multiply.
            gate_ref[...] = jax.nn.sigmoid(z + b2_ref[...]).astype(gate_ref.dtype)

    @pl.when(phase == 1)
    def _apply_phase():
        s = gate_ref[...]                                      # (C_pad, 1)
        if cache_x:
            o_ref[0] = xcache_ref[t] * s                       # no HBM re-read
        else:
            o_ref[0] = x_ref[0] * s


def se_module_pallas(x, w1a, b1, w2a, b2, *, vmem_budget_bytes=None):
    """x: (N, C, H, W).  w1a: (C, Cr), b1: (Cr,), w2a: (C, Cr), b2: (C,)."""
    N, C, H, W = x.shape
    Cr = w1a.shape[1]
    HW = H * W
    itemsize = jnp.dtype(x.dtype).itemsize

    # (8, 128)-aligned padding: channels -> sublanes, spatial -> lanes.
    sub = 8 * max(1, 4 // itemsize)              # 8 for f32, 16 for bf16
    C_pad = _round_up(C, sub)
    Cr_pad = _round_up(max(Cr, 1), LANE)

    # ---- per-generation VMEM budgeting (v7x: 64 MiB, v5e/v6e: 128 MiB) ----
    vmem_phys = 64 * 1024 * 1024                 # conservative fallback (v7x)
    try:
        vmem_phys = int(getattr(pltpu.get_tpu_info(), "vmem_capacity_bytes",
                                vmem_phys))
    except Exception:
        pass
    vmem_budget = (int(vmem_phys * 0.60) if vmem_budget_bytes is None
                   else int(vmem_budget_bytes))

    # Fixed VMEM costs: weight slabs are constant-index inputs but still get
    # double-buffered by the pipeliner -> account for 2x.  Scratch: acc+gate
    # columns are lane-padded to 128.
    w_bytes = 2 * (2 * C_pad * Cr_pad * 4 + 8 * Cr_pad * 4 + C_pad * LANE * 4)
    scratch_bytes = C_pad * LANE * 4 + C_pad * LANE * itemsize
    avail = max(vmem_budget - w_bytes - scratch_bytes,
                4 * C_pad * LANE * itemsize)

    def tile_b(lanes):
        return C_pad * lanes * itemsize

    HW_128 = _round_up(HW, LANE)

    if 4 * tile_b(HW) <= avail:
        # Path A: one full-extent spatial tile per sample.  Phase 1 reuses the
        # resident input block (same block index) -> 1 read + 1 write, and no
        # spatial padding / output slicing on the lane axis.
        hw_tile, HW_pad, n_hw, cache_x = HW, HW, 1, False
    else:
        # Path B: lane-dense tiling of the spatial axis, tile sized from the
        # VMEM budget (amortizes the ~0.35us per-grid-step overhead).
        sample_b = C_pad * HW_128 * itemsize
        cache_x = sample_b + 4 * tile_b(LANE) <= avail
        if cache_x:
            lanes = (avail - sample_b) // (5 * C_pad * itemsize)
        else:
            lanes = avail // (4 * C_pad * itemsize)
        hw_tile = int(max(LANE, min(HW_128, (lanes // LANE) * LANE)))
        if cache_x:
            while hw_tile > LANE and (4 * tile_b(hw_tile)
                                      + C_pad * _round_up(HW, hw_tile) * itemsize
                                      > avail):
                hw_tile -= LANE
        HW_pad = _round_up(HW, hw_tile)
        n_hw = HW_pad // hw_tile

    # Host-side padding only where actually needed (no-op when C, HW aligned).
    x_flat = _pad_to(x.reshape(N, C, HW), (N, C_pad, HW_pad))
    w1p = _pad_to(w1a.astype(jnp.float32), (C_pad, Cr_pad))
    b1p = _pad_to(b1.reshape(1, Cr).astype(jnp.float32), (1, Cr_pad))
    w2p = _pad_to(w2a.astype(jnp.float32), (C_pad, Cr_pad))
    b2p = _pad_to(b2.reshape(C, 1).astype(jnp.float32), (C_pad, 1))

    kernel = functools.partial(_se_kernel, cache_x=cache_x,
                               inv_hw=1.0 / float(HW))

    if cache_x:
        # Phase 1 parks the input on the last phase-0 tile -> zero input DMA.
        x_index = lambda n, p, t: (n, 0, t * (1 - p) + (n_hw - 1) * p)
    else:
        # Path A (n_hw==1): index never changes within a sample -> single read.
        # Streaming fallback: phase 1 re-reads each tile.
        x_index = lambda n, p, t: (n, 0, t)

    scratch_shapes = [
        pltpu.VMEM((C_pad, 1), jnp.float32),     # pooled-sum accumulator
        pltpu.VMEM((C_pad, 1), x.dtype),         # cached gate (output dtype)
    ]
    if cache_x:
        scratch_shapes.append(pltpu.VMEM((n_hw, C_pad, hw_tile), x.dtype))

    est_total = (4 * tile_b(hw_tile)
                 + (C_pad * HW_pad * itemsize if cache_x else 0)
                 + w_bytes + scratch_bytes)
    vmem_limit = int(min(vmem_phys * 0.8,
                         max(32 * 1024 * 1024, est_total + (8 << 20))))

    passes = 2 if (cache_x or n_hw == 1) else 3

    # TODO(synk): v7x N=1 megacore: split the spatial axis across the two
    # TensorCores (per-core partial sums + combine); with N>=2 the batch axis
    # ("parallel") already shards across cores.
    out = pl.pallas_call(
        kernel,
        out_shape=jax.ShapeDtypeStruct((N, C_pad, HW_pad), x.dtype),
        grid_spec=pltpu.PrefetchScalarGridSpec(
            num_scalar_prefetch=0,
            grid=(N, 2, n_hw),                   # (sample, phase, spatial tile)
            in_specs=[
                pl.BlockSpec((1, C_pad, hw_tile), x_index),
                pl.BlockSpec((C_pad, Cr_pad), lambda n, p, t: (0, 0)),
                pl.BlockSpec((1, Cr_pad), lambda n, p, t: (0, 0)),
                pl.BlockSpec((C_pad, Cr_pad), lambda n, p, t: (0, 0)),
                pl.BlockSpec((C_pad, 1), lambda n, p, t: (0, 0)),
            ],
            # Parked at tile 0 during phase 0 (never flushed while the index
            # is unchanged); phase 1 fully writes each tile exactly once.
            out_specs=pl.BlockSpec((1, C_pad, hw_tile),
                                   lambda n, p, t: (n, 0, t * p)),
            scratch_shapes=scratch_shapes,
        ),
        compiler_params=pltpu.CompilerParams(
            dimension_semantics=("parallel", "arbitrary", "arbitrary"),
            vmem_limit_bytes=vmem_limit,
        ),
        cost_estimate=pl.CostEstimate(
            flops=int(2 * N * C_pad * HW_pad + 4 * N * C_pad * Cr_pad),
            transcendentals=int(N * C_pad),
            bytes_accessed=int(passes * N * C_pad * HW_pad * itemsize),
        ),
    )(x_flat, w1p, b1p, w2p, b2p)

    if C_pad != C or HW_pad != HW:
        out = out[:, :C, :HW]
    return out.reshape(N, C, H, W)


def make_params(key, in_size, reduction=4, eps=1e-5):
    """Deterministic synthetic parameters; BN (eval mode) folded into the convs."""
    cr = in_size // reduction
    k = jax.random.split(key, 8)
    # Conv2d 1x1 weights, no bias: (out, in, 1, 1) -> (out, in)
    w1 = jax.random.normal(k[0], (cr, in_size), jnp.float32) * 0.3
    w2 = jax.random.normal(k[1], (in_size, cr), jnp.float32) * 0.3
    # BatchNorm params / running stats (eval mode)
    g1 = 1.0 + 0.1 * jax.random.normal(k[2], (cr,), jnp.float32)
    bt1 = 0.05 * jax.random.normal(k[3], (cr,), jnp.float32)
    m1 = 0.1 * jax.random.normal(k[4], (cr,), jnp.float32)
    v1 = 1.0 + 0.1 * jnp.abs(jax.random.normal(k[5], (cr,), jnp.float32))
    g2 = 1.0 + 0.1 * jax.random.normal(k[6], (in_size,), jnp.float32)
    bt2 = 0.05 * jax.random.normal(k[7], (in_size,), jnp.float32)
    m2 = jnp.zeros((in_size,), jnp.float32)
    v2 = jnp.ones((in_size,), jnp.float32)

    s1 = g1 / jnp.sqrt(v1 + eps)
    s2 = g2 / jnp.sqrt(v2 + eps)
    w1_fold = w1 * s1[:, None]          # (Cr, C)
    b1_fold = bt1 - s1 * m1             # (Cr,)
    w2_fold = w2 * s2[:, None]          # (C, Cr)
    b2_fold = bt2 - s2 * m2             # (C,)

    # Kernel orientation: both weight slabs are (C, Cr) — channels on the
    # sublane axis, reduced dim on lanes.
    # TODO(synk): training-mode BatchNorm (batch statistics) is not modeled;
    # eval-mode running stats are folded into the 1x1 convs.
    return w1_fold.T, b1_fold, w2_fold, b2_fold


def se_module_ref(x, w1a, b1, w2a, b2):
    pooled = jnp.mean(x, axis=(2, 3))                       # (N, C)
    h = jnp.maximum(pooled @ w1a + b1, 0.0)                 # (N, Cr)
    s = jax.nn.sigmoid(h @ w2a.T + b2)                      # (N, C)
    return x * s[:, :, None, None]


if __name__ == "__main__":
    N, C, H, W = 2, 4, 16, 16
    reduction = 4

    key = jax.random.PRNGKey(0)
    kx, kp = jax.random.split(key)
    x = jax.random.normal(kx, (N, C, H, W), jnp.float32)
    w1a, b1, w2a, b2 = make_params(kp, C, reduction)
    ref = se_module_ref(x, w1a, b1, w2a, b2)

    # 1) Auto path: single full-extent tile per sample (1 read + 1 write).
    out = jax.block_until_ready(se_module_pallas(x, w1a, b1, w2a, b2))
    assert out.shape == (N, C, H, W)
    assert jnp.allclose(out, ref, atol=1e-5, rtol=1e-5)

    # 2) Forced tiled path WITH the VMEM sample cache (phase-1 input parked).
    out_c = jax.block_until_ready(
        se_module_pallas(x, w1a, b1, w2a, b2, vmem_budget_bytes=68 * 1024))
    assert jnp.allclose(out_c, ref, atol=1e-5, rtol=1e-5)

    # 3) Forced two-pass streaming fallback (no cache, x read twice).
    out_s = jax.block_until_ready(
        se_module_pallas(x, w1a, b1, w2a, b2, vmem_budget_bytes=41 * 1024))
    assert jnp.allclose(out_s, ref, atol=1e-5, rtol=1e-5)

    print("KERNEL_OK")
</pallas_src>

<mosaic_0001>
module attributes {stable_mosaic.version = 11 : i64} {
  func.func @_se_kernel(%arg0: i32, %arg1: i32, %arg2: i32, %arg3: memref<1x8x256xf32, #tpu.memory_space<vmem>>, %arg4: memref<8x128xf32, #tpu.memory_space<vmem>>, %arg5: memref<1x128xf32, #tpu.memory_space<vmem>>, %arg6: memref<8x128xf32, #tpu.memory_space<vmem>>, %arg7: memref<8x1xf32, #tpu.memory_space<vmem>>, %arg8: memref<1x8x256xf32, #tpu.memory_space<vmem>>, %arg9: memref<8x1xf32, #tpu.memory_space<vmem>>, %arg10: memref<8x1xf32, #tpu.memory_space<vmem>>) attributes {dimension_semantics = [#tpu.dimension_semantics<parallel>, #tpu.dimension_semantics<arbitrary>, #tpu.dimension_semantics<arbitrary>], iteration_bounds = array<i64: 2, 2, 1>, scalar_prefetch = 0 : i64, scratch_operands = 2 : i64, tpu.core_type = #tpu.core_type<tc>, window_params = [{transform_indices = @transform_0, window_bounds = array<i64: 1, 8, 256>}, {pipeline_mode = #tpu.pipeline_mode<synchronous>, transform_indices = @transform_1, window_bounds = array<i64: 8, 128>}, {pipeline_mode = #tpu.pipeline_mode<synchronous>, transform_indices = @transform_2, window_bounds = array<i64: 1, 128>}, {pipeline_mode = #tpu.pipeline_mode<synchronous>, transform_indices = @transform_3, window_bounds = array<i64: 8, 128>}, {pipeline_mode = #tpu.pipeline_mode<synchronous>, transform_indices = @transform_4, window_bounds = array<i64: 8, 1>}, {transform_indices = @transform_5, window_bounds = array<i64: 1, 8, 256>}]} {
    %c0_i32 = arith.constant 0 : i32
    %0 = arith.cmpi eq, %arg1, %c0_i32 : i32
    %1 = arith.extui %0 : i1 to i32
    %c0_i32_0 = arith.constant 0 : i32
    %2 = arith.cmpi ne, %1, %c0_i32_0 : i32
    scf.if %2 {
      %c0_i32_2 = arith.constant 0 : i32
      %6 = arith.cmpi eq, %arg2, %c0_i32_2 : i32
      %7 = arith.extui %6 : i1 to i32
      %c0_i32_3 = arith.constant 0 : i32
      %8 = arith.cmpi ne, %7, %c0_i32_3 : i32
      scf.if %8 {
        %cst_12 = arith.constant 0.000000e+00 : f32
        %19 = vector.broadcast %cst_12 : f32 to vector<8x1xf32>
        %c0_13 = arith.constant 0 : index
        %c0_14 = arith.constant 0 : index
        %20 = vector.load %arg9[%c0_13, %c0_14] : memref<8x1xf32, #tpu.memory_space<vmem>>, vector<8x1xf32>
        tpu.vector_store %arg9[%c0_13, %c0_14], %19 {strides = array<i32>} : memref<8x1xf32, #tpu.memory_space<vmem>>, vector<8x1xf32>,
      } else {
      }
      %c0 = arith.constant 0 : index
      %c0_4 = arith.constant 0 : index
      %c0_5 = arith.constant 0 : index
      %9 = vector.load %arg3[%c0, %c0_4, %c0_5] : memref<1x8x256xf32, #tpu.memory_space<vmem>>, vector<1x8x256xf32>
      %10 = vector.shape_cast %9 : vector<1x8x256xf32> to vector<8x256xf32>
      %c0_6 = arith.constant 0 : index
      %c0_7 = arith.constant 0 : index
      %11 = vector.load %arg9[%c0_6, %c0_7] : memref<8x1xf32, #tpu.memory_space<vmem>>, vector<8x1xf32>
      %cst = arith.constant dense<0.000000e+00> : vector<8xf32>
      %12 = vector.multi_reduction <add>, %10, %cst [1] : vector<8x256xf32> to vector<8xf32>
      %13 = vector.shape_cast %12 : vector<8xf32> to vector<8x1xf32>
      %14 = arith.addf %11, %13 : vector<8x1xf32>
      %c0_8 = arith.constant 0 : index
      %c0_9 = arith.constant 0 : index
      %15 = vector.load %arg9[%c0_8, %c0_9] : memref<8x1xf32, #tpu.memory_space<vmem>>, vector<8x1xf32>
      tpu.vector_store %arg9[%c0_8, %c0_9], %14 {strides = array<i32>} : memref<8x1xf32, #tpu.memory_space<vmem>>, vector<8x1xf32>,
      %c0_i32_10 = arith.constant 0 : i32
      %16 = arith.cmpi eq, %arg2, %c0_i32_10 : i32
      %17 = arith.extui %16 : i1 to i32
      %c0_i32_11 = arith.constant 0 : i32
      %18 = arith.cmpi ne, %17, %c0_i32_11 : i32
      scf.if %18 {
        %c0_12 = arith.constant 0 : index
        %c0_13 = arith.constant 0 : index
        %19 = vector.load %arg9[%c0_12, %c0_13] : memref<8x1xf32, #tpu.memory_space<vmem>>, vector<8x1xf32>
        %cst_14 = arith.constant 3.906250e-03 : f32
        %20 = vector.broadcast %cst_14 : f32 to vector<8x1xf32>
        %21 = arith.mulf %19, %20 : vector<8x1xf32>
        %c0_15 = arith.constant 0 : index
        %c0_16 = arith.constant 0 : index
        %22 = vector.load %arg4[%c0_15, %c0_16] : memref<8x128xf32, #tpu.memory_space<vmem>>, vector<8x128xf32>
        %23 = vector.broadcast %21 : vector<8x1xf32> to vector<8x128xf32>
        %24 = arith.mulf %22, %23 : vector<8x128xf32>
        %cst_17 = arith.constant dense<0.000000e+00> : vector<128xf32>
        %25 = vector.multi_reduction <add>, %24, %cst_17 [0] : vector<8x128xf32> to vector<128xf32>
        %26 = vector.shape_cast %25 : vector<128xf32> to vector<1x128xf32>
        %c0_18 = arith.constant 0 : index
        %c0_19 = arith.constant 0 : index
        %27 = vector.load %arg5[%c0_18, %c0_19] : memref<1x128xf32, #tpu.memory_space<vmem>>, vector<1x128xf32>
        %28 = arith.addf %26, %27 : vector<1x128xf32>
        %cst_20 = arith.constant 0.000000e+00 : f32
        %29 = vector.broadcast %cst_20 : f32 to vector<1x128xf32>
        %30 = arith.maximumf %28, %29 : vector<1x128xf32>
        %c0_21 = arith.constant 0 : index
        %c0_22 = arith.constant 0 : index
        %31 = vector.load %arg6[%c0_21, %c0_22] : memref<8x128xf32, #tpu.memory_space<vmem>>, vector<8x128xf32>
        %32 = vector.broadcast %30 : vector<1x128xf32> to vector<8x128xf32>
        %33 = arith.mulf %31, %32 : vector<8x128xf32>
        %cst_23 = arith.constant dense<0.000000e+00> : vector<8xf32>
        %34 = vector.multi_reduction <add>, %33, %cst_23 [1] : vector<8x128xf32> to vector<8xf32>
        %35 = vector.shape_cast %34 : vector<8xf32> to vector<8x1xf32>
        %c0_24 = arith.constant 0 : index
        %c0_25 = arith.constant 0 : index
        %36 = vector.load %arg7[%c0_24, %c0_25] : memref<8x1xf32, #tpu.memory_space<vmem>>, vector<8x1xf32>
        %37 = arith.addf %35, %36 : vector<8x1xf32>
        %38 = arith.negf %37 : vector<8x1xf32>
        %39 = math.exp %38 : vector<8x1xf32>
        %cst_26 = arith.constant 1.000000e+00 : f32
        %40 = vector.broadcast %cst_26 : f32 to vector<8x1xf32>
        %41 = arith.addf %40, %39 : vector<8x1xf32>
        %42 = arith.divf %40, %41 : vector<8x1xf32>
        %c0_27 = arith.constant 0 : index
        %c0_28 = arith.constant 0 : index
        %43 = vector.load %arg10[%c0_27, %c0_28] : memref<8x1xf32, #tpu.memory_space<vmem>>, vector<8x1xf32>
        tpu.vector_store %arg10[%c0_27, %c0_28], %42 {strides = array<i32>} : memref<8x1xf32, #tpu.memory_space<vmem>>, vector<8x1xf32>,
      } else {
      }
    } else {
    }
    %c1_i32 = arith.constant 1 : i32
    %3 = arith.cmpi eq, %arg1, %c1_i32 : i32
    %4 = arith.extui %3 : i1 to i32
    %c0_i32_1 = arith.constant 0 : i32
    %5 = arith.cmpi ne, %4, %c0_i32_1 : i32
    scf.if %5 {
      %c0 = arith.constant 0 : index
      %c0_2 = arith.constant 0 : index
      %6 = vector.load %arg10[%c0, %c0_2] : memref<8x1xf32, #tpu.memory_space<vmem>>, vector<8x1xf32>
      %c0_3 = arith.constant 0 : index
      %c0_4 = arith.constant 0 : index
      %c0_5 = arith.constant 0 : index
      %7 = vector.load %arg3[%c0_3, %c0_4, %c0_5] : memref<1x8x256xf32, #tpu.memory_space<vmem>>, vector<1x8x256xf32>
      %8 = vector.shape_cast %7 : vector<1x8x256xf32> to vector<8x256xf32>
      %9 = vector.broadcast %6 : vector<8x1xf32> to vector<8x256xf32>
      %10 = arith.mulf %8, %9 : vector<8x256xf32>
      %c0_6 = arith.constant 0 : index
      %c0_7 = arith.constant 0 : index
      %c0_8 = arith.constant 0 : index
      %11 = vector.load %arg8[%c0_6, %c0_7, %c0_8] : memref<1x8x256xf32, #tpu.memory_space<vmem>>, vector<1x8x256xf32>
      %12 = vector.shape_cast %11 : vector<1x8x256xf32> to vector<8x256xf32>
      %13 = vector.shape_cast %10 : vector<8x256xf32> to vector<1x8x256xf32>
      tpu.vector_store %arg8[%c0_6, %c0_7, %c0_8], %13 {strides = array<i32>} : memref<1x8x256xf32, #tpu.memory_space<vmem>>, vector<1x8x256xf32>,
    } else {
    }
    return
  }
  func.func @transform_0(%arg0: i32, %arg1: i32, %arg2: i32) -> (i32, i32, i32) {
    %c0_i32 = arith.constant 0 : i32
    %c0_i32_0 = arith.constant 0 : i32
    return %arg0, %c0_i32, %arg2 : i32, i32, i32
  }
  func.func @transform_1(%arg0: i32, %arg1: i32, %arg2: i32) -> (i32, i32) {
    %c0_i32 = arith.constant 0 : i32
    %c0_i32_0 = arith.constant 0 : i32
    %c0_i32_1 = arith.constant 0 : i32
    return %c0_i32, %c0_i32_0 : i32, i32
  }
  func.func @transform_2(%arg0: i32, %arg1: i32, %arg2: i32) -> (i32, i32) {
    %c0_i32 = arith.constant 0 : i32
    %c0_i32_0 = arith.constant 0 : i32
    %c0_i32_1 = arith.constant 0 : i32
    return %c0_i32, %c0_i32_0 : i32, i32
  }
  func.func @transform_3(%arg0: i32, %arg1: i32, %arg2: i32) -> (i32, i32) {
    %c0_i32 = arith.constant 0 : i32
    %c0_i32_0 = arith.constant 0 : i32
    %c0_i32_1 = arith.constant 0 : i32
    return %c0_i32, %c0_i32_0 : i32, i32
  }
  func.func @transform_4(%arg0: i32, %arg1: i32, %arg2: i32) -> (i32, i32) {
    %c0_i32 = arith.constant 0 : i32
    %c0_i32_0 = arith.constant 0 : i32
    %c0_i32_1 = arith.constant 0 : i32
    return %c0_i32, %c0_i32_0 : i32, i32
  }
  func.func @transform_5(%arg0: i32, %arg1: i32, %arg2: i32) -> (i32, i32, i32) {
    %0 = arith.muli %arg2, %arg1 : i32
    %c0_i32 = arith.constant 0 : i32
    %c0_i32_0 = arith.constant 0 : i32
    return %arg0, %c0_i32, %0 : i32, i32, i32
  }
}

</mosaic_0001>

<bundles_post_ra>
// kernel: tpu_custom_call.1
= control target key start
LH: loop header
LB: loop body
LE: loop exit
PB: predicated region body
PF: predicated region fallthrough
CT: control target
= control target key end

     0   :  { %s1003_s0 = inlined_call_operand.hbm [shape: f32[2,8,256], index: 0, kind: input, shape index: {}]   ;;  %s1004_s1 = inlined_call_operand.vmem [shape: f32[8,128], index: 1, kind: input, shape index: {}]   ;;  %s1005_s2 = inlined_call_operand.vmem [shape: f32[1,128], index: 2, kind: input, shape index: {}]   ;;  %s1006_s3 = inlined_call_operand.hbm [shape: f32[8,128], index: 3, kind: input, shape index: {}]   ;;  %s1007_s4 = inlined_call_operand.vmem [shape: f32[8,1], index: 4, kind: input, shape index: {}]   ;;  %s1008_s5 = inlined_call_operand.hbm [shape: f32[2,8,256], index: 5, kind: output, shape index: {}]  }
   0x1   :  { %1011 = sst [smem:[#allocation16_spill]] %s1006_s3 }
   0x2   :  { %10 = vsyncpa [#allocation5], 0 }
   0x3   :  { %12 = vsyncpa [#allocation5 + $0x1], 0 }
   0x4   :  { %13 = vsyncpa [#allocation8], 0 }
   0x5   :  { %14 = vsyncpa [#allocation6], 0 }
   0x6   :  { %16 = vsyncpa [#allocation6 + $0x1], 0  ;;  %s809_s18 = smov 0   ;;  %s811_s19 = smov 0  }
   0x7   :  { %s813_s20 = smov 0   ;;  %s815_s21 = smov 0  }
   0x8   :  { %s817_s22 = smov 0   ;;  %s819_s23 = smov 0  }
   0x9   :  { %s821_s24 = smov 0   ;;  %s823_s25 = smov 0  }
   0xa LB: > { %1012 = sst [smem:[#allocation13_spill]] %s765_s23  ;;  %s491_s26 = sadd.s32 4294967295, %s773_s25   ;;  %s773_s25 = sphi %s823_s25, %s22_s25   ;;  %s769_s24 = sphi %s821_s24, %s1030_s24   ;;  %s765_s23 = sphi %s819_s23, %s1025_s23   ;;  %s761_s22 = sphi %s817_s22, %s1029_s22   ;;  %s757_s21 = sphi %s815_s21, %s1024_s21   ;;  %s753_s20 = sphi %s813_s20, %s1028_s20   ;;  %s749_s19 = sphi %s811_s19, %s1027_s19   ;;  %s745_s18 = sphi %s809_s18, %s1026_s18  }
   0xb   : > { %s492_s27 = sadd.s32 4294967294, %s773_s25   ;;  %p63_p0 = scmp.ne.s32.totalorder %s749_s19, %s745_s18 }
   0xc   : > { %p853_p1 = scmp.eq.s32.totalorder %s491_s26, 0  ;;  %p857_p2 = scmp.eq.s32.totalorder %s491_s26, 3 }
   0xd   : > { %p181_p3 = scmp.eq.s32.totalorder %s492_s27, 3  ;;  %p493_p5 = scmp.ge.s32.totalorder %s773_s25, 1 }
   0xe   : > { %p863_p4 = por %p853_p1, %p63_p0  ;;  %p188_p7 = scmp.lt.s32.totalorder %s773_s25, 5 }
   0xf   : > { %p868_p6 = por %p181_p3, %p63_p0  ;;  %s1018_s3 = sld [smem:[#allocation16_spill]] }
  0x10   : > { %p876_p8 = pnand %p493_p5, %p188_p7  ;;  %s775_s11 = smov [#allocation7]  }
  0x11   : > { %s1016_s6 = scalar_select %p868_p6, 1, 0 }
  0x12   : > { %p521_p9 = pneg %p876_p8  ;;  %s208_s12 = sshll.u32 %s775_s11, 4  ;;  %s209_s12 = int_to_ptr.vmem [resolvable:$true] %s208_s12 }
  0x13   : > { %1017 = sst [smem:[#allocation14_spill]] %s1016_s6  ;;  %s37_s13 = sadd.s32 1, %s765_s23 }
  0x14   : > { %p522_p10 = pnand %p521_p9, %p853_p1  ;;  %p39_p11 = scmp.ge.s32.totalorder %s37_s13, 2 }
  0x15   : > { %s206_s9 = sshll.u32 %s1018_s3, 4  ;;  %s41_s14 = sadd.s32 1, %s769_s24  ;;  %s207_s9 = int_to_ptr.hbm [resolvable:$true] %s206_s9 }
  0x16   : > { %524 = dma.hbm_to_vmem [thread:$0]  (!%p522_p10), %s207_s9, 128, %s209_s12, [#allocation8]  }
  0x17   : > { %s50_s15 = sadd.s32 1, %s753_s20  ;;  %p57_p12 = scmp.ne.s32.totalorder %s753_s20, %s749_s19 }
  0x18   : > { %s1032_s13 = smov (%p39_p11, %s37_s13), 0  ;;  %s1034_s14 = smov (!%p39_p11, %s41_s14), %s769_s24 }
  0x19   : > { %1020 = sst [smem:[#allocation15_spill]] %s1032_s13  ;;  %p58_p13 = scmp.eq.s32.totalorder %s773_s25, 0 }
  0x1a   : > { %p895_p0 = por %p857_p2, %p57_p12  ;;  %p43_p3 = scmp.ge.s32.totalorder %s1034_s14, 2 }
  0x1b   : > { %p534_p5 = scmp.lt.s32.totalorder %s773_s25, 4  ;;  %p900_p7 = por %p58_p13, %p57_p12 }
  0x1c   : > { %s222_s26 = sand.u32 1, %s753_s20   ;;  %s1036_s14 = smov (%p43_p3, %s1034_s14), 0 }
  0x1d   : > { %s496_s27 = sshll.u32 %s222_s26, 4  ;;  %s45_s7 = ssub.s32 %s769_s24, %s1036_s14 }
  0x1e   : > { %p48_p9 = scmp.eq.s32.totalorder %s45_s7, 0  ;;  %s511_s29 = sshll.u32 %s769_s24, 4 }
  0x1f   : > { %s233_s11 = scalar_lea.hbm %s1003_s0, %s511_s29  ;;  %s226_s12 = scalar_lea.vmem [#allocation4], %s496_s27 }
  0x20   : > { %s237_s3 = sshll.u32 %s226_s12, 4  ;;  %s235_s23 = sshll.u32 %s233_s11, 4  ;;  %s238_s3 = int_to_ptr.vmem [resolvable:$true] %s237_s3  ;;  %s236_s23 = int_to_ptr.hbm [resolvable:$true] %s235_s23 }
  0x21   : > { %s914_s13 = scalar_select %p48_p9, %s753_s20, %s50_s15  }
  0x22   : > { %p526_p2 = pnand %p534_p5, %p900_p7  ;;  %s223_s6 = scalar_lea.sflag [#allocation5], %s222_s26 }
  0x23   : > { %246 = sbr.rel (%p876_p8) target bundleno = 608 (0x260), region = 40  ;;  %s923_s7 = sand.u32 (!%p876_p8), 1, %s749_s19  }
  0x24   : > { %528 = dma.hbm_to_vmem [thread:$0]  (!%p526_p2), %s236_s23, 256, %s238_s3, %s223_s6  }
  0x25   : > { %s500_s27 = sshll.u32 (!%p876_p8), %s923_s7, 4  ;;  %s249_s15 = scalar_lea.sflag (!%p876_p8), [#allocation5], %s923_s7 }
  0x26   : > { %s927_s29 = scalar_lea.vmem (!%p876_p8), [#allocation4], %s500_s27 }
  0x28   : > { %732 = dma.done.wait (%p863_p4), %s249_s15, 256  }
  0x29   : > { %734 = vsyncadd (%p863_p4), %s249_s15, 4294967040 }
  0x2a   : > { %736 = dma.done.wait (%p853_p1), [#allocation8], 128  }
  0x2b   : > { %738 = vsyncadd (%p853_p1), [#allocation8], 4294967168  ;;  %s937_s3 = scalar_lea.vmem [#allocation9], %s500_s27  ;;  %p503_p8 = scmp.ne.s32.totalorder %s757_s21, 0 }
  0x2d   : > { %291 = sbr.rel (%p503_p8) target bundleno = 465 (0x1d1), region = 52 }
  0x32   : > { %v298_v0 = vld [vmem:[%s927_s29] sm:$0xff]  ;;  %v299_v1 = vld [vmem:[%s927_s29 + $0x8] sm:$0xff]  ;;  %vm296_vm0 = vcmask 7168   ;;  %v776_v3 = vmov 0.0   ;;  %v777_v4 = vmov 0  }
  0x33   : > { %v301_v2 = vadd.f32 %v299_v1, %v298_v0  ;;  %297 = vst.msk [vmem:[#allocation2] sm:$0xff] %vm296_vm0, %v776_v3  ;;  %605 = vset.pattern.permute.xlu0 %v777_v4  ;;  %v312_v10 = vld [vmem:[%s1004_s1] sm:$0xff]  ;;  %v328_v22 = vld [vmem:[#allocation7] sm:$0xff] }
  0x34   : > { %v325_v18 = vld [vmem:[%s1005_s2] sm:$0x1] }
  0x35   : > { %302 = vadd.xlane.f32.xlu0 %v301_v2  ;;  %v333_v25 = vld [vmem:[%s1007_s4] sm:$0xff] }
  0x3a   : > { %v300_v5 = vld [vmem:[#allocation2] sm:$0xff] }
  0xa8   : > { %v303_v6 = vpop.xlane.xlu0 %302 }
  0xa9   : > { %v304_v7 = vadd.f32 %v303_v6, %v300_v5 }
  0xab   : > { %306 = vst.msk [vmem:[#allocation2] sm:$0xff] %vm296_vm0, %v304_v7 }
  0xb2   : > { %v310_v8 = vld [vmem:[#allocation2] sm:$0xff] }
  0xb3   : > { %v311_v9 = vmul.f32 0.00390625, %v310_v8 }
  0xb5   : > { %315 = vperm.xlu0 %605, %v311_v9  }
 0x127   : > { %v316_v11 = vpop.permute.xlu0 %315 }
 0x128   : > { %v318_v12 = vmul.f32 %v316_v11, %v312_v10 }
 0x12a   : > { %v319_v13 = vrot.slane %v318_v12, 4 }
 0x12c   : > { %v320_v14 = vadd.f32 %v319_v13, %v318_v12 }
 0x12e   : > { %v321_v15 = vrot.slane %v320_v14, 2 }
 0x130   : > { %v322_v16 = vadd.f32 %v321_v15, %v320_v14 }
 0x132   : > { %v323_v17 = vrot.slane %v322_v16, 1 }
 0x134   : > { %v324_v19 = vadd.f32 %v323_v17, %v322_v16 }
 0x136   : > { %v326_v20 = vadd.f32 %v325_v18, %v324_v19 }
 0x138   : > { %v327_v21 = vmax.f32 %v326_v20, 0.0 }
 0x13a   : > { %v329_v23 = vperm.slane %v327_v21, 0 }
 0x13c   : > { %v330_v24 = vmul.f32 %v329_v23, %v328_v22 }
 0x13e   : > { %331 = vadd.xlane.f32.xlu1 %v330_v24 }
 0x1b1   : > { %v332_v26 = vpop.xlane.xlu1 %331 }
 0x1b2   : > { %v334_v27 = vadd.f32 %v333_v25, %v332_v26 }
 0x1b4   : > { %v504_v28 = vmul.f32 -1.442695, %v334_v27 }
 0x1b6   : > { %606 = vpow2.f32 %v504_v28 }
 0x1bc   : > { %v607_v29 = vpop.eup %606 }
 0x1bd   : > { %v338_v30 = vadd.f32 1.0, %v607_v29 }
 0x1bf   : > { %608 = vrcp.f32 %v338_v30  ;;  %v350_v34 = vand.u32 2147483648, %v338_v30  ;;  %v348_v36 = vand.u32 2147483647, %v338_v30  ;;  %vm344_vm2 = vweird.f32 %v338_v30 }
 0x1c1   : > { %v351_v38 = vor.u32 1.1754944e-38, %v350_v34  ;;  %vm349_vm4 = vcmp.eq.f32.partialorder %v348_v36, 8.507059e+37 }
 0x1c5   : > { %v609_v31 = vpop.eup %608 }
 0x1c6   : > { %v340_v32 = vmul.f32 %v609_v31, %v338_v30  ;;  %vm345_vm1 = vweird.f32 %v609_v31 }
 0x1c7   : > { %vm346_vm3 = vmor %vm344_vm2, %vm345_vm1 }
 0x1c8   : > { %v341_v33 = vsub.f32 1.0, %v340_v32 }
 0x1ca   : > { %v342_v35 = vmul.f32 %v609_v31, %v341_v33 }
 0x1cc   : > { %v343_v37 = vadd.f32 %v609_v31, %v342_v35 }
 0x1ce   : > { %v347_v39 = vsel %vm346_vm3, %v609_v31, %v343_v37 }
 0x1cf   : > { %v352_v40 = vsel %vm349_vm4, %v351_v38, %v347_v39 }
 0x1d0   : > { %354 = vst.msk [vmem:[#allocation3] sm:$0xff] %vm296_vm0, %v352_v40 }
 0x1d1 PF: > { %p505_p1 = scmp.ne.s32.totalorder %s757_s21, 1 }
 0x1d3   : > { %358 = sbr.rel (%p505_p1) target bundleno = 593 (0x251), region = 64 }
 0x1d8   : > { %v359_v41 = vld [vmem:[#allocation3] sm:$0xff]  ;;  %v778_v42 = vmov 0   ;;  %v360_v43 = vld [vmem:[%s927_s29] sm:$0xff] }
 0x1d9   : > { %610 = vset.pattern.permute.xlu0 %v778_v42  ;;  %v361_v44 = vld [vmem:[%s927_s29 + $0x8] sm:$0xff] }
 0x1da   : > { %364 = vperm.xlu0 %610, %v359_v41  }
 0x24c   : > { %v365_v45 = vpop.permute.xlu0 %364 }
 0x24d   : > { %v367_v46 = vmul.f32 %v365_v45, %v360_v43  ;;  %v368_v47 = vmul.f32 %v365_v45, %v361_v44 }
 0x24f   : > { %369 = vst [vmem:[%s937_s3] sm:$0xff] %v367_v46 }
 0x250   : > { %370 = vst [vmem:[%s937_s3 + $0x8] sm:$0xff] %v368_v47 }
 0x251 PF: > { %s512_s21 = sshll.u32 %s761_s22, 4  ;;  %s388_s11 = sshll.u32 %s937_s3, 4  ;;  %s389_s11 = int_to_ptr.vmem [resolvable:$true] %s388_s11 }
 0x252   : > { %s386_s9 = scalar_lea.hbm %s1008_s5, %s512_s21  ;;  %s372_s27 = scalar_lea.sflag [#allocation6], %s923_s7 }
 0x253   : > { %s390_s12 = sshll.u32 %s386_s9, 4  ;;  %s691_s22 = scalar_lea.hbm %s1008_s5, 32  ;;  %s391_s12 = int_to_ptr.hbm [resolvable:$true] %s390_s12 }
 0x254   : > { %s685_s15 = sshra.s32 %s391_s12, 4  ;;  %s686_s15 = int_to_ptr.hbm [resolvable:$true] %s685_s15 }
 0x255   : > { %s687_s29 = scalar_lea.hbm %s686_s15, 16  ;;  %p692_p12 = scmp.lt.s32.totalorder %s686_s15, %s1008_s5 }
 0x256   : > { %p688_p4 = scmp.ne.s32.totalorder %s686_s15, %s687_s29  ;;  %p693_p13 = scmp.lt.s32.totalorder %s691_s22, %s687_s29 }
 0x258   : > { %p689_p10 = pnand %p688_p4, %p895_p0  ;;  %p694_p3 = por %p693_p13, %p692_p12 }
 0x25a   : > { %p690_p11 = pneg %p689_p10 }
 0x25c   : > { %p695_p5 = pnand %p694_p3, %p690_p11 }
 0x25e   : > { %698 = shalt.err (!%p695_p5)
}
 0x25f   : > { %519 = dma.vmem_to_hbm [thread:$0]  (%p895_p0), %s389_s11, 256, %s391_s12, %s372_s27  }
 0x260 PF: > { %p536_p7 = scmp.ge.s32.totalorder %s773_s25, 2  ;;  %s402_s3 = sand.u32 1, %s745_s18  }
 0x261   : > { %s403_s10 = scalar_lea.sflag [#allocation6], %s402_s3 }
 0x262   : > { %p530_p9 = pnand %p536_p7, %p868_p6 }
 0x264   : > { %p531_p2 = pneg %p530_p9 }
 0x266   : > { %740 = dma.done.wait (%p531_p2), %s403_s10, 256  }
 0x267   : > { %742 = vsyncadd (%p531_p2), %s403_s10, 4294967040  ;;  %s22_s25 = sadd.s32 1, %s773_s25   ;;  %s1024_s21 = sld [smem:[#allocation13_spill]] }
 0x268   : > { %p19_p8 = scmp.ge.s32.totalorder %s22_s25, 6   ;;  %s1025_s23 = sld [smem:[#allocation15_spill]] }
 0x269   : > { %s1026_s18 = smov %s749_s19  ;;  %s1027_s19 = smov %s753_s20 }
 0x26a   : > { %s1028_s20 = smov %s914_s13  ;;  %s1029_s22 = smov %s769_s24 }
 0x26b   : > { %s1030_s24 = smov %s1036_s14  ;;  %21 = sbr.rel (!%p19_p8) target bundleno = 10 (0xa), region = 105 }
 0x270   :  { %409 = vsyncpa [#allocation5], 1 }
 0x271   :  { %411 = vsyncpa [#allocation5 + $0x1], 1 }
 0x272   :  { %412 = vsyncpa [#allocation8], 1 }
 0x273   :  { %413 = vsyncpa [#allocation6], 1 }
 0x274   :  { %415 = vsyncpa [#allocation6 + $0x1], 1 }

</bundles_post_ra>
